<compile_context>
chip_gen: v7x
topology: tpu7x:2x2x1
jax: 0.10.0
libtpu: 0.0.40
codegen_flags: <defaults>
</compile_context>

<pallas_src>
import functools

import jax
import jax.numpy as jnp
from jax.experimental import pallas as pl
from jax.experimental.pallas import tpu as pltpu

_LANES = 128


def _round_up(x: int, m: int) -> int:
    return ((x + m - 1) // m) * m


def _vmem_budget_bytes() -> int:
    """Pick a per-step VMEM working-set budget from the actual chip."""
    try:
        cap = int(pltpu.get_tpu_info().vmem_capacity_bytes)
    except Exception:
        cap = 64 * 1024 * 1024          # conservative (v7x per-TC) fallback
    # ~1/3 of physical VMEM, capped so v5e/v6e (128 MiB) stay well inside the
    # 32 MiB scoped limit requested below; floor keeps tiny chips workable.
    return max(8 * 1024 * 1024, min(24 * 1024 * 1024, cap // 3))


def _plan_row_tiling(n_rows: int, dtype_bytes: int, sublanes: int,
                     n_dma_streams: int, n_live_f32: int = 12):
    """Pick a row-tile height TR (multiple of `sublanes`) and padded rows.

    Per grid step the pipeline holds `n_dma_streams` double-buffered
    (TR, 128) tiles of the I/O dtype plus ~`n_live_f32` f32 intermediate
    planes inside the kernel body.  Tiles are balanced across the grid so
    padding overhead stays below one sublane group per tile.
    """
    budget = _vmem_budget_bytes()
    per_row = (n_dma_streams * dtype_bytes * 2 + n_live_f32 * 4) * _LANES
    tr_max = max(sublanes, (budget // per_row) // sublanes * sublanes)
    rows_al = _round_up(max(n_rows, 1), sublanes)
    if tr_max >= rows_al:
        return rows_al, rows_al
    n_tiles = -(-rows_al // tr_max)                      # ceil
    tr = _round_up(-(-rows_al // n_tiles), sublanes)     # balanced height
    return tr, tr * n_tiles


def _dvs_lx_kernel(px, py, u0, v0, border, cw, tr, zinv_is_scalar,
                   zinv_ref, ix_ref, iy_ref, o_ref):
    """One (TR, 128) tile of one batch element.

    ix/iy (and zinv, when per-pixel) are (1, TR, 128) blocks; the output is a
    (1, 6, TR, 128) block of lane-dense planes.  xs/ys are recomputed from the
    flattened pixel index instead of being streamed from HBM.
    """
    f32 = jnp.float32
    row0 = pl.program_id(1) * tr

    # Flattened pixel index of every element in this tile.
    r = jax.lax.broadcasted_iota(jnp.int32, (tr, _LANES), 0)
    lane = jax.lax.broadcasted_iota(jnp.int32, (tr, _LANES), 1)
    idx_f = ((row0 + r) * _LANES + lane).astype(f32)

    # idx // cw and idx % cw via float reciprocal + exact +/-1 correction.
    cw_f = float(cw)
    v = jnp.floor(idx_f * (1.0 / cw_f))
    u = idx_f - v * cw_f
    v = jnp.where(u < 0.0, v - 1.0, v)
    u = jnp.where(u < 0.0, u + cw_f, u)
    v = jnp.where(u >= cw_f, v + 1.0, v)
    u = jnp.where(u >= cw_f, u - cw_f, u)

    xs = ((u + border) - u0) * (1.0 / px)
    ys = ((v + border) - v0) * (1.0 / py)
    xsys = xs * ys

    ix = ix_ref[0].astype(f32) * px
    iy = iy_ref[0].astype(f32) * py
    if zinv_is_scalar:
        z = zinv_ref[pl.program_id(0)]          # f32 scalar from SMEM
    else:
        z = zinv_ref[0].astype(f32)             # (TR, 128) plane

    od = o_ref.dtype
    o_ref[0, 0] = (ix * z).astype(od)
    o_ref[0, 1] = (iy * z).astype(od)
    o_ref[0, 2] = (-(xs * ix + ys * iy) * z).astype(od)
    o_ref[0, 3] = (-ix * xsys - (1.0 + ys * ys) * iy).astype(od)
    o_ref[0, 4] = ((1.0 + xs * xs) * ix + iy * xsys).astype(od)
    o_ref[0, 5] = (iy * xs - ix * ys).astype(od)


class DVSInteractionMatrix:
    """JAX/Pallas port of the PyTorch DVSInteractionMatrix module."""

    def __init__(self, h, w, px, py, u0, v0, border):
        self.px = float(px)
        self.py = float(py)
        self.u0 = float(u0)
        self.v0 = float(v0)
        self.border = int(border)
        self.h = int(h)
        self.w = int(w)
        self.cropped_h = self.h - 2 * self.border
        self.cropped_w = self.w - 2 * self.border
        # Reference buffers (kept for parity/debugging; the kernel recomputes
        # these analytically in-register and never streams them).
        us = jnp.arange(self.border, self.w - self.border, dtype=jnp.float32)
        vs = jnp.arange(self.border, self.h - self.border, dtype=jnp.float32)
        self.xs = jnp.tile((us - self.u0) / self.px, self.cropped_h)      # (N,)
        self.ys = jnp.repeat((vs - self.v0) / self.py, self.cropped_w)    # (N,)

    def __call__(self, x, planar: bool = False):
        Ix, Iy, Zinv = x
        n = self.cropped_h * self.cropped_w
        dtype = jnp.dtype(Ix.dtype)
        sublanes = max(8, 32 // max(dtype.itemsize, 1))   # 8 / 16 / 32

        # Mirror torch .view(-1, N).
        ixv = Ix.reshape(-1, n)
        iyv = Iy.reshape(-1, n)
        b = ixv.shape[0]

        # Per-batch-scalar Zinv goes to SMEM; per-pixel Zinv is streamed.
        zarr = jnp.asarray(Zinv)
        zinv_is_scalar = (zarr.size == b) or (zarr.size == 1)
        n_streams = (2 if zinv_is_scalar else 3) + 6       # HBM planes/step

        rows = -(-n // _LANES)
        tr, rows_pad = _plan_row_tiling(rows, dtype.itemsize, sublanes, n_streams)
        n_pad = rows_pad * _LANES

        def to_rows(a2d):   # (b, n) -> (b, rows_pad, 128), pad only if needed
            if n_pad != n:
                a2d = jnp.pad(a2d, ((0, 0), (0, n_pad - n)))
            return a2d.reshape(b, rows_pad, _LANES)

        img_spec = pl.BlockSpec((1, tr, _LANES), lambda bi, ri: (bi, ri, 0))
        out_spec = pl.BlockSpec((1, 6, tr, _LANES), lambda bi, ri: (bi, 0, ri, 0))

        if zinv_is_scalar:
            z_op = jnp.broadcast_to(zarr.reshape(-1).astype(jnp.float32), (b,))
            z_spec = pl.BlockSpec(memory_space=pltpu.MemorySpace.SMEM)
        else:
            zv = jnp.asarray(zarr, dtype)
            if zv.size == b * n:
                zv = zv.reshape(b, n)
            else:
                zv = jnp.broadcast_to(zv, (b, n))
            z_op = to_rows(zv)
            z_spec = img_spec

        total = b * rows_pad * _LANES
        cost = pl.CostEstimate(
            flops=40 * total,
            transcendentals=0,
            bytes_accessed=n_streams * total * dtype.itemsize)

        out = pl.pallas_call(
            functools.partial(_dvs_lx_kernel, self.px, self.py, self.u0,
                              self.v0, float(self.border),
                              float(self.cropped_w), tr, zinv_is_scalar),
            out_shape=jax.ShapeDtypeStruct((b, 6, rows_pad, _LANES), dtype),
            grid_spec=pltpu.PrefetchScalarGridSpec(
                num_scalar_prefetch=0,
                grid=(b, rows_pad // tr),
                in_specs=[z_spec, img_spec, img_spec],
                out_specs=out_spec,
            ),
            compiler_params=pltpu.CompilerParams(
                dimension_semantics=("parallel", "parallel"),
                vmem_limit_bytes=32 * 1024 * 1024,
            ),
            cost_estimate=cost,
        )(z_op, to_rows(ixv), to_rows(iyv))

        out = out.reshape(b, 6, n_pad)[:, :, :n]     # (B, 6, N), contiguous
        if planar:
            # Recommended layout for downstream consumers (no transpose).
            return out
        # PyTorch-compatible (B, N, 6): one transpose of layout glue.
        return jnp.swapaxes(out, 1, 2)


def _reference(model, Ix, Iy, Zinv):
    """Pure-JAX mirror of the PyTorch forward, for correctness checking."""
    n = model.cropped_h * model.cropped_w
    ixv = Ix.reshape(-1, n) * model.px
    iyv = Iy.reshape(-1, n) * model.py
    b = ixv.shape[0]
    zv = jnp.broadcast_to(jnp.asarray(Zinv, ixv.dtype).reshape(b, -1), (b, n))
    xs, ys = model.xs, model.ys
    xsys = xs * ys
    cols = [ixv * zv,
            iyv * zv,
            -(xs * ixv + ys * iyv) * zv,
            -ixv * xsys - (1.0 + ys ** 2) * iyv,
            (1.0 + xs ** 2) * ixv + iyv * xsys,
            iyv * xs - ixv * ys]
    return jnp.stack(cols, axis=-1)


if __name__ == "__main__":
    key = jax.random.PRNGKey(0)
    k1, k2, k3, k4, k5, k6 = jax.random.split(key, 6)
    B = 2

    # Case 1: f32, per-pixel Zinv, 20x20 sensor, border 2 -> N = 256 (aligned).
    m1 = DVSInteractionMatrix(20, 20, 200.0, 200.0, 10.0, 10.0, 2)
    ch, cw = m1.cropped_h, m1.cropped_w
    Ix = jax.random.normal(k1, (B, ch, cw), dtype=jnp.float32)
    Iy = jax.random.normal(k2, (B, ch, cw), dtype=jnp.float32)
    Zinv = jax.random.uniform(k3, (B, ch * cw), dtype=jnp.float32,
                              minval=0.1, maxval=2.0)
    Ls = jax.block_until_ready(m1((Ix, Iy, Zinv)))
    ref = _reference(m1, Ix, Iy, Zinv)
    assert Ls.shape == (B, ch * cw, 6), Ls.shape
    assert jnp.allclose(Ls, ref, rtol=1e-5, atol=1e-4)

    # Planar fast path (no wrapper transpose): (B, 6, N).
    Lp = jax.block_until_ready(m1((Ix, Iy, Zinv), planar=True))
    assert Lp.shape == (B, 6, ch * cw), Lp.shape
    assert jnp.allclose(jnp.swapaxes(Lp, 1, 2), ref, rtol=1e-5, atol=1e-4)

    # Case 2: f32, per-batch-scalar Zinv (SMEM path), 20x17 sensor -> N = 208
    # (exercises the ragged / non-128-multiple tail).
    m2 = DVSInteractionMatrix(20, 17, 180.0, 190.0, 9.5, 8.5, 2)
    ch2, cw2 = m2.cropped_h, m2.cropped_w
    Ix2 = jax.random.normal(k4, (B, ch2, cw2), dtype=jnp.float32)
    Iy2 = jax.random.normal(k5, (B, ch2, cw2), dtype=jnp.float32)
    Z2 = jax.random.uniform(k6, (B, 1), dtype=jnp.float32,
                            minval=0.1, maxval=2.0)
    Ls2 = jax.block_until_ready(m2((Ix2, Iy2, Z2)))
    ref2 = _reference(m2, Ix2, Iy2, Z2)
    assert Ls2.shape == (B, ch2 * cw2, 6), Ls2.shape
    assert jnp.allclose(Ls2, ref2, rtol=1e-5, atol=1e-4)

    # Case 3: bf16 inputs (f32 compute in-kernel, cast only at the store).
    Ls3 = jax.block_until_ready(
        m2((Ix2.astype(jnp.bfloat16), Iy2.astype(jnp.bfloat16), Z2)))
    assert Ls3.dtype == jnp.bfloat16
    assert jnp.allclose(Ls3.astype(jnp.float32), ref2, rtol=3e-2, atol=0.5)

    print("KERNEL_OK")
</pallas_src>

<mosaic_0001>
module attributes {stable_mosaic.version = 11 : i64} {
  func.func @_dvs_lx_kernel(%arg0: i32, %arg1: i32, %arg2: memref<1x8x128xf32, #tpu.memory_space<vmem>>, %arg3: memref<1x8x128xf32, #tpu.memory_space<vmem>>, %arg4: memref<1x8x128xf32, #tpu.memory_space<vmem>>, %arg5: memref<1x6x8x128xf32, #tpu.memory_space<vmem>>) attributes {dimension_semantics = [#tpu.dimension_semantics<parallel>, #tpu.dimension_semantics<parallel>], iteration_bounds = array<i64: 2, 1>, scalar_prefetch = 0 : i64, scratch_operands = 0 : i64, tpu.core_type = #tpu.core_type<tc>, window_params = [{transform_indices = @transform_0, window_bounds = array<i64: 1, 8, 128>}, {transform_indices = @transform_1, window_bounds = array<i64: 1, 8, 128>}, {transform_indices = @transform_2, window_bounds = array<i64: 1, 8, 128>}, {transform_indices = @transform_3, window_bounds = array<i64: 1, 6, 8, 128>}]} {
    %c8_i32 = arith.constant 8 : i32
    %0 = arith.muli %arg1, %c8_i32 : i32
    %1 = tpu.iota {dimensions = array<i32: 0>} : vector<8x128xi32>
    %2 = tpu.iota {dimensions = array<i32: 1>} : vector<8x128xi32>
    %3 = vector.broadcast %0 : i32 to vector<8x128xi32>
    %4 = arith.addi %3, %1 : vector<8x128xi32>
    %c128_i32 = arith.constant 128 : i32
    %5 = vector.broadcast %c128_i32 : i32 to vector<8x128xi32>
    %6 = arith.muli %4, %5 : vector<8x128xi32>
    %7 = arith.addi %6, %2 : vector<8x128xi32>
    %8 = arith.sitofp %7 : vector<8x128xi32> to vector<8x128xf32>
    %cst = arith.constant 6.250000e-02 : f32
    %9 = vector.broadcast %cst : f32 to vector<8x128xf32>
    %10 = arith.mulf %8, %9 : vector<8x128xf32>
    %11 = math.floor %10 : vector<8x128xf32>
    %cst_0 = arith.constant 1.600000e+01 : f32
    %12 = vector.broadcast %cst_0 : f32 to vector<8x128xf32>
    %13 = arith.mulf %11, %12 : vector<8x128xf32>
    %14 = arith.subf %8, %13 : vector<8x128xf32>
    %cst_1 = arith.constant 0.000000e+00 : f32
    %15 = vector.broadcast %cst_1 : f32 to vector<8x128xf32>
    %16 = arith.cmpf olt, %14, %15 : vector<8x128xf32>
    %cst_2 = arith.constant 1.000000e+00 : f32
    %17 = vector.broadcast %cst_2 : f32 to vector<8x128xf32>
    %18 = arith.subf %11, %17 : vector<8x128xf32>
    %19 = arith.select %16, %18, %11 : vector<8x128xi1>, vector<8x128xf32>
    %cst_3 = arith.constant 0.000000e+00 : f32
    %20 = vector.broadcast %cst_3 : f32 to vector<8x128xf32>
    %21 = arith.cmpf olt, %14, %20 : vector<8x128xf32>
    %cst_4 = arith.constant 1.600000e+01 : f32
    %22 = vector.broadcast %cst_4 : f32 to vector<8x128xf32>
    %23 = arith.addf %14, %22 : vector<8x128xf32>
    %24 = arith.select %21, %23, %14 : vector<8x128xi1>, vector<8x128xf32>
    %cst_5 = arith.constant 1.600000e+01 : f32
    %25 = vector.broadcast %cst_5 : f32 to vector<8x128xf32>
    %26 = arith.cmpf oge, %24, %25 : vector<8x128xf32>
    %cst_6 = arith.constant 1.000000e+00 : f32
    %27 = vector.broadcast %cst_6 : f32 to vector<8x128xf32>
    %28 = arith.addf %19, %27 : vector<8x128xf32>
    %29 = arith.select %26, %28, %19 : vector<8x128xi1>, vector<8x128xf32>
    %cst_7 = arith.constant 1.600000e+01 : f32
    %30 = vector.broadcast %cst_7 : f32 to vector<8x128xf32>
    %31 = arith.cmpf oge, %24, %30 : vector<8x128xf32>
    %cst_8 = arith.constant 1.600000e+01 : f32
    %32 = vector.broadcast %cst_8 : f32 to vector<8x128xf32>
    %33 = arith.subf %24, %32 : vector<8x128xf32>
    %34 = arith.select %31, %33, %24 : vector<8x128xi1>, vector<8x128xf32>
    %cst_9 = arith.constant 2.000000e+00 : f32
    %35 = vector.broadcast %cst_9 : f32 to vector<8x128xf32>
    %36 = arith.addf %34, %35 : vector<8x128xf32>
    %cst_10 = arith.constant 1.000000e+01 : f32
    %37 = vector.broadcast %cst_10 : f32 to vector<8x128xf32>
    %38 = arith.subf %36, %37 : vector<8x128xf32>
    %cst_11 = arith.constant 5.000000e-03 : f32
    %39 = vector.broadcast %cst_11 : f32 to vector<8x128xf32>
    %40 = arith.mulf %38, %39 : vector<8x128xf32>
    %cst_12 = arith.constant 2.000000e+00 : f32
    %41 = vector.broadcast %cst_12 : f32 to vector<8x128xf32>
    %42 = arith.addf %29, %41 : vector<8x128xf32>
    %cst_13 = arith.constant 1.000000e+01 : f32
    %43 = vector.broadcast %cst_13 : f32 to vector<8x128xf32>
    %44 = arith.subf %42, %43 : vector<8x128xf32>
    %cst_14 = arith.constant 5.000000e-03 : f32
    %45 = vector.broadcast %cst_14 : f32 to vector<8x128xf32>
    %46 = arith.mulf %44, %45 : vector<8x128xf32>
    %47 = arith.mulf %40, %46 : vector<8x128xf32>
    %c0 = arith.constant 0 : index
    %c0_15 = arith.constant 0 : index
    %c0_16 = arith.constant 0 : index
    %48 = vector.load %arg3[%c0, %c0_15, %c0_16] : memref<1x8x128xf32, #tpu.memory_space<vmem>>, vector<1x8x128xf32>
    %49 = vector.shape_cast %48 : vector<1x8x128xf32> to vector<8x128xf32>
    %cst_17 = arith.constant 2.000000e+02 : f32
    %50 = vector.broadcast %cst_17 : f32 to vector<8x128xf32>
    %51 = arith.mulf %49, %50 : vector<8x128xf32>
    %c0_18 = arith.constant 0 : index
    %c0_19 = arith.constant 0 : index
    %c0_20 = arith.constant 0 : index
    %52 = vector.load %arg4[%c0_18, %c0_19, %c0_20] : memref<1x8x128xf32, #tpu.memory_space<vmem>>, vector<1x8x128xf32>
    %53 = vector.shape_cast %52 : vector<1x8x128xf32> to vector<8x128xf32>
    %cst_21 = arith.constant 2.000000e+02 : f32
    %54 = vector.broadcast %cst_21 : f32 to vector<8x128xf32>
    %55 = arith.mulf %53, %54 : vector<8x128xf32>
    %c0_22 = arith.constant 0 : index
    %c0_23 = arith.constant 0 : index
    %c0_24 = arith.constant 0 : index
    %56 = vector.load %arg2[%c0_22, %c0_23, %c0_24] : memref<1x8x128xf32, #tpu.memory_space<vmem>>, vector<1x8x128xf32>
    %57 = vector.shape_cast %56 : vector<1x8x128xf32> to vector<8x128xf32>
    %58 = arith.mulf %51, %57 : vector<8x128xf32>
    %c0_25 = arith.constant 0 : index
    %c0_26 = arith.constant 0 : index
    %c0_27 = arith.constant 0 : index
    %c0_28 = arith.constant 0 : index
    %59 = vector.load %arg5[%c0_25, %c0_26, %c0_27, %c0_28] : memref<1x6x8x128xf32, #tpu.memory_space<vmem>>, vector<1x1x8x128xf32>
    %60 = vector.shape_cast %59 : vector<1x1x8x128xf32> to vector<8x128xf32>
    %61 = vector.shape_cast %58 : vector<8x128xf32> to vector<1x1x8x128xf32>
    tpu.vector_store %arg5[%c0_25, %c0_26, %c0_27, %c0_28], %61 {strides = array<i32>} : memref<1x6x8x128xf32, #tpu.memory_space<vmem>>, vector<1x1x8x128xf32>,
    %62 = arith.mulf %55, %57 : vector<8x128xf32>
    %c0_29 = arith.constant 0 : index
    %c1 = arith.constant 1 : index
    %c0_30 = arith.constant 0 : index
    %c0_31 = arith.constant 0 : index
    %63 = vector.load %arg5[%c0_29, %c1, %c0_30, %c0_31] : memref<1x6x8x128xf32, #tpu.memory_space<vmem>>, vector<1x1x8x128xf32>
    %64 = vector.shape_cast %63 : vector<1x1x8x128xf32> to vector<8x128xf32>
    %65 = vector.shape_cast %62 : vector<8x128xf32> to vector<1x1x8x128xf32>
    tpu.vector_store %arg5[%c0_29, %c1, %c0_30, %c0_31], %65 {strides = array<i32>} : memref<1x6x8x128xf32, #tpu.memory_space<vmem>>, vector<1x1x8x128xf32>,
    %66 = arith.mulf %40, %51 : vector<8x128xf32>
    %67 = arith.mulf %46, %55 : vector<8x128xf32>
    %68 = arith.addf %66, %67 : vector<8x128xf32>
    %cst_32 = arith.constant 0.000000e+00 : f32
    %69 = vector.broadcast %cst_32 : f32 to vector<8x128xf32>
    %70 = arith.subf %69, %68 : vector<8x128xf32>
    %71 = arith.mulf %70, %57 : vector<8x128xf32>
    %c0_33 = arith.constant 0 : index
    %c2 = arith.constant 2 : index
    %c0_34 = arith.constant 0 : index
    %c0_35 = arith.constant 0 : index
    %72 = vector.load %arg5[%c0_33, %c2, %c0_34, %c0_35] : memref<1x6x8x128xf32, #tpu.memory_space<vmem>>, vector<1x1x8x128xf32>
    %73 = vector.shape_cast %72 : vector<1x1x8x128xf32> to vector<8x128xf32>
    %74 = vector.shape_cast %71 : vector<8x128xf32> to vector<1x1x8x128xf32>
    tpu.vector_store %arg5[%c0_33, %c2, %c0_34, %c0_35], %74 {strides = array<i32>} : memref<1x6x8x128xf32, #tpu.memory_space<vmem>>, vector<1x1x8x128xf32>,
    %cst_36 = arith.constant 0.000000e+00 : f32
    %75 = vector.broadcast %cst_36 : f32 to vector<8x128xf32>
    %76 = arith.subf %75, %51 : vector<8x128xf32>
    %77 = arith.mulf %76, %47 : vector<8x128xf32>
    %78 = arith.mulf %46, %46 : vector<8x128xf32>
    %cst_37 = arith.constant 1.000000e+00 : f32
    %79 = vector.broadcast %cst_37 : f32 to vector<8x128xf32>
    %80 = arith.addf %79, %78 : vector<8x128xf32>
    %81 = arith.mulf %80, %55 : vector<8x128xf32>
    %82 = arith.subf %77, %81 : vector<8x128xf32>
    %c0_38 = arith.constant 0 : index
    %c3 = arith.constant 3 : index
    %c0_39 = arith.constant 0 : index
    %c0_40 = arith.constant 0 : index
    %83 = vector.load %arg5[%c0_38, %c3, %c0_39, %c0_40] : memref<1x6x8x128xf32, #tpu.memory_space<vmem>>, vector<1x1x8x128xf32>
    %84 = vector.shape_cast %83 : vector<1x1x8x128xf32> to vector<8x128xf32>
    %85 = vector.shape_cast %82 : vector<8x128xf32> to vector<1x1x8x128xf32>
    tpu.vector_store %arg5[%c0_38, %c3, %c0_39, %c0_40], %85 {strides = array<i32>} : memref<1x6x8x128xf32, #tpu.memory_space<vmem>>, vector<1x1x8x128xf32>,
    %86 = arith.mulf %40, %40 : vector<8x128xf32>
    %cst_41 = arith.constant 1.000000e+00 : f32
    %87 = vector.broadcast %cst_41 : f32 to vector<8x128xf32>
    %88 = arith.addf %87, %86 : vector<8x128xf32>
    %89 = arith.mulf %88, %51 : vector<8x128xf32>
    %90 = arith.mulf %55, %47 : vector<8x128xf32>
    %91 = arith.addf %89, %90 : vector<8x128xf32>
    %c0_42 = arith.constant 0 : index
    %c4 = arith.constant 4 : index
    %c0_43 = arith.constant 0 : index
    %c0_44 = arith.constant 0 : index
    %92 = vector.load %arg5[%c0_42, %c4, %c0_43, %c0_44] : memref<1x6x8x128xf32, #tpu.memory_space<vmem>>, vector<1x1x8x128xf32>
    %93 = vector.shape_cast %92 : vector<1x1x8x128xf32> to vector<8x128xf32>
    %94 = vector.shape_cast %91 : vector<8x128xf32> to vector<1x1x8x128xf32>
    tpu.vector_store %arg5[%c0_42, %c4, %c0_43, %c0_44], %94 {strides = array<i32>} : memref<1x6x8x128xf32, #tpu.memory_space<vmem>>, vector<1x1x8x128xf32>,
    %95 = arith.mulf %55, %40 : vector<8x128xf32>
    %96 = arith.mulf %51, %46 : vector<8x128xf32>
    %97 = arith.subf %95, %96 : vector<8x128xf32>
    %c0_45 = arith.constant 0 : index
    %c5 = arith.constant 5 : index
    %c0_46 = arith.constant 0 : index
    %c0_47 = arith.constant 0 : index
    %98 = vector.load %arg5[%c0_45, %c5, %c0_46, %c0_47] : memref<1x6x8x128xf32, #tpu.memory_space<vmem>>, vector<1x1x8x128xf32>
    %99 = vector.shape_cast %98 : vector<1x1x8x128xf32> to vector<8x128xf32>
    %100 = vector.shape_cast %97 : vector<8x128xf32> to vector<1x1x8x128xf32>
    tpu.vector_store %arg5[%c0_45, %c5, %c0_46, %c0_47], %100 {strides = array<i32>} : memref<1x6x8x128xf32, #tpu.memory_space<vmem>>, vector<1x1x8x128xf32>,
    return
  }
  func.func @transform_0(%arg0: i32, %arg1: i32) -> (i32, i32, i32) {
    %c0_i32 = arith.constant 0 : i32
    %c0_i32_0 = arith.constant 0 : i32
    return %arg0, %arg1, %c0_i32 : i32, i32, i32
  }
  func.func @transform_1(%arg0: i32, %arg1: i32) -> (i32, i32, i32) {
    %c0_i32 = arith.constant 0 : i32
    %c0_i32_0 = arith.constant 0 : i32
    return %arg0, %arg1, %c0_i32 : i32, i32, i32
  }
  func.func @transform_2(%arg0: i32, %arg1: i32) -> (i32, i32, i32) {
    %c0_i32 = arith.constant 0 : i32
    %c0_i32_0 = arith.constant 0 : i32
    return %arg0, %arg1, %c0_i32 : i32, i32, i32
  }
  func.func @transform_3(%arg0: i32, %arg1: i32) -> (i32, i32, i32, i32) {
    %c0_i32 = arith.constant 0 : i32
    %c0_i32_0 = arith.constant 0 : i32
    %c0_i32_1 = arith.constant 0 : i32
    return %arg0, %c0_i32, %arg1, %c0_i32_0 : i32, i32, i32, i32
  }
}

</mosaic_0001>

<bundles_post_ra>
// kernel: tpu_custom_call.1
= control target key start
LH: loop header
LB: loop body
LE: loop exit
PB: predicated region body
PF: predicated region fallthrough
CT: control target
= control target key end

     0   :  { %s1068_s0 = inlined_call_operand.hbm [shape: f32[2,8,128], index: 0, kind: input, shape index: {}]   ;;  %s1069_s1 = inlined_call_operand.hbm [shape: f32[2,8,128], index: 1, kind: input, shape index: {}]   ;;  %s1070_s2 = inlined_call_operand.hbm [shape: f32[2,8,128], index: 2, kind: input, shape index: {}]   ;;  %s1071_s3 = inlined_call_operand.hbm [shape: f32[2,6,8,128], index: 3, kind: output, shape index: {}]  }
   0x1   :  { %1077 = sst [smem:[#allocation15_spill]] %s1069_s1 }
   0x2   :  { %8 = vsyncpa [#allocation3], 0 }
   0x3   :  { %10 = vsyncpa [#allocation3 + $0x1], 0 }
   0x4   :  { %11 = vsyncpa [#allocation6], 0 }
   0x5   :  { %13 = vsyncpa [#allocation6 + $0x1], 0 }
   0x6   :  { %14 = vsyncpa [#allocation4], 0 }
   0x7   :  { %16 = vsyncpa [#allocation4 + $0x1], 0  ;;  %s798_s12 = smov 0   ;;  %s800_s13 = smov 0  }
   0x8   :  { %s802_s14 = smov 0   ;;  %s804_s15 = smov 0  }
   0x9   :  { %s806_s16 = smov 0   ;;  %s808_s17 = smov 0  }
   0xa LB: > { %1078 = sst [smem:[#allocation12_spill]] %s766_s16  ;;  %s829_s18 = sadd.s32 4294967295, %s770_s17   ;;  %s770_s17 = sphi %s808_s17, %s22_s17   ;;  %s766_s16 = sphi %s806_s16, %s1099_s16   ;;  %s762_s15 = sphi %s804_s15, %s1098_s15   ;;  %s758_s14 = sphi %s802_s14, %s1102_s14   ;;  %s754_s13 = sphi %s800_s13, %s1101_s13   ;;  %s750_s12 = sphi %s798_s12, %s1100_s12  }
   0xb   : > { %s493_s19 = sadd.s32 4294967294, %s770_s17   ;;  %s34_s20 = sadd.s32 1, %s766_s16 }
   0xc   : > { %s43_s21 = sadd.s32 1, %s758_s14  ;;  %p36_p0 = scmp.ge.s32.totalorder %s34_s20, 2 }
   0xd   : > { %p50_p1 = scmp.ne.s32.totalorder %s758_s14, %s754_s13  ;;  %p51_p2 = scmp.eq.s32.totalorder %s770_s17, 0 }
   0xe   : > { %p56_p3 = scmp.ne.s32.totalorder %s754_s13, %s750_s12  ;;  %s1104_s20 = smov (%p36_p0, %s34_s20), 0 }
   0xf   : > { %1079 = sst [smem:[#allocation13_spill]] %s1104_s20  ;;  %p841_p4 = por %p51_p2, %p50_p1 }
  0x10   : > { %p57_p5 = scmp.eq.s32.totalorder %s829_s18, 0  ;;  %s38_s23 = ssub.s32 %s766_s16, %s1104_s20 }
  0x11   : > { %p138_p6 = scmp.eq.s32.totalorder %s829_s18, 1  ;;  %p41_p7 = scmp.eq.s32.totalorder %s38_s23, 0 }
  0x12   : > { %p849_p8 = por %p57_p5, %p56_p3  ;;  %p144_p10 = scmp.eq.s32.totalorder %s493_s19, 1 }
  0x13   : > { %p853_p9 = por %p138_p6, %p50_p1  ;;  %p542_p13 = scmp.lt.s32.totalorder %s770_s17, 2 }
  0x14   : > { %s1081_s24 = scalar_select %p849_p8, 1, 0 }
  0x15   : > { %s1082_s25 = scalar_select %p853_p9, 1, 0 }
  0x16   : > { %s858_s26 = scalar_select %p41_p7, %s758_s14, %s43_s21  }
  0x17   : > { %p860_p11 = por %p144_p10, %p56_p3  ;;  %s164_s28 = sand.u32 1, %s758_s14  }
  0x18   : > { %1083 = sst [smem:[#allocation14_spill]] %s858_s26  ;;  %s869_s29 = sshll.u32 %s164_s28, 3 }
  0x19   : > { %s1084_s27 = scalar_select %p860_p11, 1, 0 }
  0x1a   : > { %s872_s30 = sshll.u32 %s766_s16, 7  ;;  %p876_p0 = pnand %p542_p13, %p841_p4 }
  0x1b   : > { %s183_s5 = sand.u32 1, %s770_s17   ;;  %s1086_s1 = sld [smem:[#allocation15_spill]] }
  0x1c   : > { %s1085_s4 = scalar_select %p876_p0, 1, 0 }
  0x1d   : > { %s187_s9 = scalar_lea.vmem [#allocation5], %s869_s29  ;;  %s892_s11 = scalar_lea.sflag [#allocation6], %s183_s5 }
  0x1e   : > { %s195_s10 = sshll.u32 %s187_s9, 4  ;;  %p898_p4 = pneg %p876_p0  ;;  %s889_s10 = int_to_ptr.vmem [resolvable:$true] %s195_s10 }
  0x21   : > { %s885_s8 = scalar_lea.hbm %s1086_s1, %s872_s30  ;;  %s599_s6 = scalar_lea.hbm %s1086_s1, 256 }
  0x22   : > { %s594_s19 = scalar_lea.hbm %s885_s8, 128  ;;  %p600_p7 = scmp.lt.u32.totalorder %s885_s8, %s1086_s1 }
  0x23   : > { %p595_p3 = scmp.ne.s32.totalorder %s885_s8, %s594_s19  ;;  %p601_p10 = scmp.lt.u32.totalorder %s599_s6, %s594_s19 }
  0x24   : > { %p603_p12 = scmp.lt.u32.totalorder %s594_s19, %s885_s8 }
  0x25   : > { %p597_p5 = pnand %p898_p4, %p595_p3  ;;  %p602_p13 = por %p601_p10, %p600_p7 }
  0x27   : > { %p598_p6 = pneg %p597_p5  ;;  %p604_p1 = por %p603_p12, %p602_p13 }
  0x29   : > { %p605_p2 = pnand %p604_p1, %p598_p6 }
  0x2b   : > { %608 = shalt.err (!%p605_p2)
}
  0x2c   : > { %s609_s5 = scalar_lea.vmem %s889_s10, 128  ;;  %s772_s22 = smov [#allocation5]  }
  0x2d   : > { %p610_p3 = scmp.ne.s32.totalorder %s889_s10, %s609_s5  ;;  %s614_s23 = sshll.u32 %s772_s22, 4  ;;  %s615_s23 = int_to_ptr.vmem [resolvable:$false] %s614_s23 }
  0x2e   : > { %s616_s7 = scalar_lea.vmem %s615_s23, 256  ;;  %p617_p9 = scmp.lt.s32.totalorder %s889_s10, %s615_s23 }
  0x2f   : > { %p612_p5 = pnand %p610_p3, %p898_p4  ;;  %p618_p8 = scmp.lt.s32.totalorder %s616_s7, %s609_s5 }
  0x31   : > { %p613_p11 = pneg %p612_p5  ;;  %p619_p7 = por %p618_p8, %p617_p9 }
  0x33   : > { %p620_p10 = pnand %p619_p7, %p613_p11 }
  0x35   : > { %623 = shalt.err (!%p620_p10)
}
  0x36   : > { %534 = dma.hbm_to_vmem [thread:$0]  (!%p876_p0), %s885_s8, 128, %s889_s10, %s892_s11  }
  0x37   : > { %p1088_p12 = scmp.lt.s32.totalorder %s770_s17, 3  ;;  %p1089_p1 = scmp.ge.s32.totalorder %s770_s17, 1 }
  0x38   : > { %s934_s5 = scalar_lea.hbm %s1068_s0, %s872_s30  ;;  %s168_s22 = scalar_lea.vmem [#allocation2], %s869_s29 }
  0x39   : > { %p926_p2 = pnand %p1089_p1, %p1088_p12  ;;  %s176_s23 = sshll.u32 %s168_s22, 4  ;;  %s937_s23 = int_to_ptr.vmem [resolvable:$true] %s176_s23 }
  0x3a   : > { %s943_s7 = scalar_lea.hbm %s1070_s2, %s872_s30  ;;  %s165_s1 = scalar_lea.sflag [#allocation3], %s164_s28 }
  0x3b   : > { %s1090_s19 = scalar_select %p926_p2, 1, 0 }
  0x3c   : > { %s624_s20 = scalar_lea.hbm %s934_s5, 128  ;;  %s629_s16 = scalar_lea.hbm %s1068_s0, 256 }
  0x3d   : > { %p625_p8 = scmp.ne.s32.totalorder %s934_s5, %s624_s20  ;;  %p630_p6 = scmp.lt.u32.totalorder %s934_s5, %s1068_s0 }
  0x3e   : > { %p631_p13 = scmp.lt.u32.totalorder %s629_s16, %s624_s20  ;;  %p633_p5 = scmp.lt.u32.totalorder %s624_s20, %s934_s5 }
  0x3f   : > { %p627_p9 = pnand %p625_p8, %p898_p4 }
  0x40   : > { %p632_p3 = por %p631_p13, %p630_p6 }
  0x41   : > { %p628_p11 = pneg %p627_p9 }
  0x42   : > { %p634_p7 = por %p633_p5, %p632_p3 }
  0x44   : > { %p635_p10 = pnand %p634_p7, %p628_p11 }
  0x46   : > { %638 = shalt.err (!%p635_p10)
}
  0x47   : > { %s639_s28 = scalar_lea.vmem %s937_s23, 128  ;;  %s773_s30 = smov [#allocation2]  }
  0x48   : > { %p640_p12 = scmp.ne.s32.totalorder %s937_s23, %s639_s28  ;;  %s644_s8 = sshll.u32 %s773_s30, 4  ;;  %s645_s8 = int_to_ptr.vmem [resolvable:$false] %s644_s8 }
  0x49   : > { %s646_s26 = scalar_lea.vmem %s645_s8, 256  ;;  %p647_p9 = scmp.lt.s32.totalorder %s937_s23, %s645_s8 }
  0x4a   : > { %p642_p1 = pnand %p640_p12, %p898_p4  ;;  %p648_p2 = scmp.lt.s32.totalorder %s646_s26, %s639_s28 }
  0x4c   : > { %p643_p8 = pneg %p642_p1  ;;  %p649_p6 = por %p648_p2, %p647_p9 }
  0x4e   : > { %p650_p13 = pnand %p649_p6, %p643_p8 }
  0x50   : > { %653 = shalt.err (!%p650_p13)
}
  0x51   : > { %531 = dma.hbm_to_vmem [thread:$0]  (!%p876_p0), %s934_s5, 128, %s937_s23, %s165_s1  }
  0x52   : > { %s206_s16 = scalar_lea.vmem [#allocation7], %s869_s29  ;;  %s654_s10 = scalar_lea.hbm %s943_s7, 128 }
  0x53   : > { %s214_s20 = sshll.u32 %s206_s16, 4  ;;  %p655_p11 = scmp.ne.s32.totalorder %s943_s7, %s654_s10  ;;  %s215_s20 = int_to_ptr.vmem [resolvable:$true] %s214_s20 }
  0x54   : > { %s659_s22 = scalar_lea.hbm %s1070_s2, 256  ;;  %p660_p5 = scmp.lt.u32.totalorder %s943_s7, %s1070_s2 }
  0x55   : > { %p657_p2 = pnand %p655_p11, %p898_p4  ;;  %p661_p7 = scmp.lt.u32.totalorder %s659_s22, %s654_s10 }
  0x56   : > { %p663_p12 = scmp.lt.u32.totalorder %s654_s10, %s943_s7 }
  0x57   : > { %p658_p3 = pneg %p657_p2  ;;  %p662_p10 = por %p661_p7, %p660_p5 }
  0x59   : > { %p664_p1 = por %p663_p12, %p662_p10 }
  0x5b   : > { %p665_p8 = pnand %p664_p1, %p658_p3 }
  0x5d   : > { %668 = shalt.err (!%p665_p8)
}
  0x5e   : > { %s669_s1 = scalar_lea.vmem %s215_s20, 128  ;;  %s774_s29 = smov [#allocation7]  }
  0x5f   : > { %p670_p9 = scmp.ne.s32.totalorder %s215_s20, %s669_s1  ;;  %s674_s5 = sshll.u32 %s774_s29, 4  ;;  %s675_s5 = int_to_ptr.vmem [resolvable:$false] %s674_s5 }
  0x60   : > { %s676_s23 = scalar_lea.vmem %s675_s5, 256  ;;  %p677_p11 = scmp.lt.s32.totalorder %s215_s20, %s675_s5 }
  0x61   : > { %p672_p6 = pnand %p670_p9, %p898_p4  ;;  %p678_p2 = scmp.lt.s32.totalorder %s676_s23, %s669_s1 }
  0x63   : > { %p673_p13 = pneg %p672_p6  ;;  %p679_p0 = por %p678_p2, %p677_p11 }
  0x65   : > { %p680_p5 = pnand %p679_p0, %p673_p13 }
  0x67   : > { %683 = shalt.err (!%p680_p5)
}
  0x68   : > { %p1091_p7 = scmp.ne.s32.totalorder %s1085_s4, 0  ;;  %p1092_p3 = scmp.ne.s32.totalorder %s1090_s19, 0 }
  0x69   : > { %s990_s21 = sand.u32 (!%p1092_p3), 1, %s754_s13   ;;  %p1093_p4 = scmp.ne.s32.totalorder (!%p1092_p3), %s1081_s24, 0 }
  0x6a   : > { %537 = dma.hbm_to_vmem [thread:$0]  (!%p1091_p7), %s943_s7, 128, %s215_s20, %s892_s11  }
  0x6b   : > { %223 = sbr.rel (%p1092_p3) target bundleno = 171 (0xab), region = 32  ;;  %s503_s8 = sshll.u32 (!%p1092_p3), %s990_s21, 3 }
  0x6c   : > { %s226_s26 = scalar_lea.sflag (!%p1092_p3), [#allocation3], %s990_s21  ;;  %s229_s16 = scalar_lea.vmem (!%p1092_p3), [#allocation2], %s503_s8 }
  0x72   : > { %737 = dma.done.wait (%p1093_p4), %s226_s26, 128  }
  0x73   : > { %739 = vsyncadd (%p1093_p4), %s226_s26, 4294967168  ;;  %s234_s4 = sand.u32 1, %s829_s18   ;;  %s238_s19 = scalar_lea.vmem [#allocation5], %s503_s8 }
  0x74   : > { %s235_s11 = scalar_lea.sflag [#allocation6], %s234_s4 }
  0x75   : > { %741 = dma.done.wait (%p1093_p4), %s235_s11, 256  }
  0x76   : > { %743 = vsyncadd (%p1093_p4), %s235_s11, 4294967040  ;;  %v281_v0 = vlaneseq  ;;  %s518_s7 = smul.u32 48, %s990_s21  ;;  %v311_v5 = vld [vmem:[%s238_s19] sm:$0xff]  ;;  %v315_v6 = vld [vmem:[%s229_s16] sm:$0xff]  ;;  %s247_s20 = scalar_lea.vmem [#allocation7], %s503_s8 }
  0x77   : > { %v313_v7 = vld [vmem:[%s247_s20] sm:$0xff]  ;;  %v312_v8 = vmul.f32 200.0, %v311_v5  ;;  %s519_s24 = smul.u32 768, %s762_s15  ;;  %s349_s22 = scalar_lea.sflag [#allocation4], %s990_s21 }
  0x78   : > { %v282_v1 = vshrl.u32 %v281_v0, 7  ;;  %v284_v2 = vand.u32 127, %v281_v0  ;;  %v314_v9 = vmul.f32 200.0, %v313_v7  ;;  %s1004_s18 = scalar_lea.vmem [#allocation8], %s518_s7  ;;  %p1094_p10 = scmp.ne.s32.totalorder %s1082_s25, 0 }
  0x79   : > { %v316_v11 = vmul.f32 %v315_v6, %v312_v8  ;;  %v328_v31 = vsub.f32 0.0, %v312_v8  ;;  %s363_s10 = sshll.u32 %s1004_s18, 4  ;;  %s1014_s15 = scalar_lea.hbm %s1071_s3, %s519_s24  ;;  %s1016_s10 = int_to_ptr.vmem [resolvable:$true] %s363_s10 }
  0x7a   : > { %v287_v3 = vmul.u32 128, %v282_v1  ;;  %v318_v12 = vmul.f32 %v315_v6, %v314_v9  ;;  %s684_s28 = scalar_lea.vmem %s1016_s10, 768  ;;  %s775_s30 = smov [#allocation8]  }
  0x7b   : > { %317 = vst [vmem:[%s1004_s18] sm:$0xff] %v316_v11  ;;  %p685_p0 = scmp.ne.s32.totalorder %s1016_s10, %s684_s28  ;;  %s688_s1 = sshll.u32 %s775_s30, 4  ;;  %s689_s1 = int_to_ptr.vmem [resolvable:$false] %s688_s1 }
  0x7c   : > { %v288_v4 = vadd.s32 %v287_v3, %v284_v2  ;;  %510 = vst [vmem:[%s1004_s18 + $0x8] sm:$0xff] %v318_v12  ;;  %s690_s29 = scalar_lea.vmem %s689_s1, 1536  ;;  %p691_p8 = scmp.lt.s32.totalorder %s1016_s10, %s689_s1 }
  0x7d   : > { %p686_p12 = pnand %p685_p0, %p1094_p10  ;;  %p692_p9 = scmp.lt.s32.totalorder %s690_s29, %s684_s28 }
  0x7e   : > { %v289_v10 = vcvt.s32.f32 %v288_v4 }
  0x7f   : > { %p687_p1 = pneg %p686_p12  ;;  %p693_p6 = por %p692_p9, %p691_p8 }
  0x80   : > { %v290_v13 = vmul.f32 0.0625, %v289_v10 }
  0x81   : > { %p694_p13 = pnand %p693_p6, %p687_p1 }
  0x82   : > { %v291_v14 = vfloor.f32 %v290_v13 }
  0x84   : > { %v292_v15 = vmul.f32 16.0, %v291_v14  ;;  %v506_v16 = vadd.f32 -1.0, %v291_v14 }
  0x86   : > { %v293_v17 = vsub.f32 %v289_v10, %v292_v15 }
  0x88   : > { %vm294_vm0 = vcmp.lt.f32.partialorder %v293_v17, 0.0  ;;  %v297_v18 = vadd.f32 16.0, %v293_v17 }
  0x89   : > { %v296_v19 = vsel %vm294_vm0, %v506_v16, %v291_v14 }
  0x8a   : > { %v298_v20 = vsel %vm294_vm0, %v297_v18, %v293_v17  ;;  %v300_v21 = vadd.f32 1.0, %v296_v19 }
  0x8b   : > { %vm299_vm1 = vcmp.ge.f32.partialorder %v298_v20, 16.0  ;;  %v507_v22 = vadd.f32 -16.0, %v298_v20 }
  0x8c   : > { %v301_v23 = vsel %vm299_vm1, %v300_v21, %v296_v19 }
  0x8d   : > { %v303_v24 = vsel %vm299_vm1, %v507_v22, %v298_v20  ;;  %v307_v25 = vadd.f32 2.0, %v301_v23 }
  0x8e   : > { %v304_v26 = vadd.f32 2.0, %v303_v24 }
  0x8f   : > { %v509_v27 = vadd.f32 -10.0, %v307_v25 }
  0x90   : > { %v508_v28 = vadd.f32 -10.0, %v304_v26 }
  0x91   : > { %v309_v29 = vmul.f32 0.005, %v509_v27 }
  0x92   : > { %v306_v30 = vmul.f32 0.005, %v508_v28 }
  0x93   : > { %v322_v32 = vmul.f32 %v314_v9, %v309_v29  ;;  %v330_v33 = vmul.f32 %v309_v29, %v309_v29  ;;  %v344_v34 = vmul.f32 %v312_v8, %v309_v29 }
  0x94   : > { %v321_v35 = vmul.f32 %v312_v8, %v306_v30  ;;  %v310_v36 = vmul.f32 %v309_v29, %v306_v30  ;;  %v336_v37 = vmul.f32 %v306_v30, %v306_v30  ;;  %v343_v38 = vmul.f32 %v314_v9, %v306_v30 }
  0x95   : > { %v331_v39 = vadd.f32 1.0, %v330_v33 }
  0x96   : > { %v323_v40 = vadd.f32 %v322_v32, %v321_v35  ;;  %v329_v41 = vmul.f32 %v328_v31, %v310_v36  ;;  %v337_v42 = vadd.f32 1.0, %v336_v37  ;;  %v339_v43 = vmul.f32 %v314_v9, %v310_v36 }
  0x97   : > { %v332_v44 = vmul.f32 %v331_v39, %v314_v9  ;;  %v345_v45 = vsub.f32 %v343_v38, %v344_v34 }
  0x98   : > { %v324_v46 = vsub.f32 0.0, %v323_v40  ;;  %v338_v47 = vmul.f32 %v337_v42, %v312_v8 }
  0x99   : > { %v333_v48 = vsub.f32 %v329_v41, %v332_v44  ;;  %514 = vst [vmem:[%s1004_s18 + $0x28] sm:$0xff] %v345_v45 }
  0x9a   : > { %v325_v49 = vmul.f32 %v324_v46, %v315_v6  ;;  %v340_v50 = vadd.f32 %v339_v43, %v338_v47 }
  0x9b   : > { %512 = vst [vmem:[%s1004_s18 + $0x18] sm:$0xff] %v333_v48 }
  0x9c   : > { %511 = vst [vmem:[%s1004_s18 + $0x10] sm:$0xff] %v325_v49  ;;  %513 = vst [vmem:[%s1004_s18 + $0x20] sm:$0xff] %v340_v50 }
  0x9d   : > { %697 = shalt.err (!%p694_p13)
}
  0x9e   : > { %s698_s5 = scalar_lea.hbm %s1014_s15, 768  ;;  %s702_s26 = scalar_lea.hbm %s1071_s3, 1536 }
  0x9f   : > { %p699_p11 = scmp.ne.s32.totalorder %s1014_s15, %s698_s5  ;;  %p703_p7 = scmp.lt.u32.totalorder %s1014_s15, %s1071_s3 }
  0xa0   : > { %p704_p3 = scmp.lt.u32.totalorder %s702_s26, %s698_s5  ;;  %p706_p0 = scmp.lt.u32.totalorder %s698_s5, %s1014_s15 }
  0xa1   : > { %p700_p2 = pnand %p699_p11, %p1094_p10 }
  0xa2   : > { %p705_p4 = por %p704_p3, %p703_p7 }
  0xa3   : > { %p701_p5 = pneg %p700_p2 }
  0xa4   : > { %p707_p12 = por %p706_p0, %p705_p4 }
  0xa6   : > { %p708_p1 = pnand %p707_p12, %p701_p5 }
  0xa8   : > { %711 = shalt.err (!%p708_p1)
}
  0xa9   : > { %s776_s11 = smov 128   ;;  %s777_s19 = smov 8  }
  0xaa   : > { %526 = dma.vmem_to_hbm [thread:$0]  (%p1094_p10), %s1016_s10, 768, %s1014_s15, %s349_s22, %s776_s11, %s776_s11, %s777_s19  }
  0xab PF: > { %s378_s7 = sand.u32 1, %s750_s12   ;;  %p1095_p8 = scmp.ne.s32.totalorder %s1084_s27, 0 }
  0xac   : > { %p1096_p9 = scmp.ge.s32.totalorder %s770_s17, 2  ;;  %s379_s20 = scalar_lea.sflag [#allocation4], %s378_s7 }
  0xae   : > { %p539_p6 = pnand %p1096_p9, %p1095_p8 }
  0xb0   : > { %745 = dma.done.wait (!%p539_p6), %s379_s20, 768  }
  0xb1   : > { %747 = vsyncadd (!%p539_p6), %s379_s20, 4294966528  ;;  %s22_s17 = sadd.s32 1, %s770_s17   ;;  %s1097_s18 = sld [smem:[#allocation14_spill]] }
  0xb2   : > { %p19_p13 = scmp.ge.s32.totalorder %s22_s17, 4   ;;  %s1098_s15 = sld [smem:[#allocation12_spill]] }
  0xb3   : > { %s1099_s16 = sld [smem:[#allocation13_spill]]  ;;  %s1100_s12 = smov %s754_s13 }
  0xb4   : > { %s1101_s13 = smov %s758_s14  ;;  %21 = sbr.rel (!%p19_p13) target bundleno = 10 (0xa), region = 106 }
  0xb7   : > { %s1102_s14 = smov %s1097_s18 }
  0xbb   :  { %384 = vsyncpa [#allocation3], 1 }
  0xbc   :  { %386 = vsyncpa [#allocation3 + $0x1], 1 }
  0xbd   :  { %387 = vsyncpa [#allocation6], 1 }
  0xbe   :  { %389 = vsyncpa [#allocation6 + $0x1], 1 }
  0xbf   :  { %390 = vsyncpa [#allocation4], 1 }
  0xc0   :  { %392 = vsyncpa [#allocation4 + $0x1], 1 }

</bundles_post_ra>
